<compile_context>
chip_gen: v5e
topology: v5e:2x2
jax: 0.10.0
libtpu: 0.0.40
codegen_flags: <defaults>
</compile_context>

<pallas_src>
import functools
import numpy as np
import jax
import jax.numpy as jnp
from jax.experimental import pallas as pl
from jax.experimental.pallas import tpu as pltpu


# ---------------------------------------------------------------------------
# Fused kernel:
#   num_layers x SAGEConv(mean) -> lin0+ReLU -> batch sum -> gather z==1/z==2
#   rows -> elementwise product -> Linear+ReLU -> Linear(->1, lane padded).
# Batch (B=2) is packed on the lane axis: xp = [x_b0 | x_b1]  (N, 2H).
# ---------------------------------------------------------------------------
def _psage_kernel(a_ref, xp_ref, wcatT_ref, bl_ref, w0T_ref, b0_ref, bsum_ref,
                  w1T_ref, b1_ref, w2T_ref, b2_ref, src_ref, dst_ref, o_ref,
                  *, num_layers):
    f32 = jnp.float32
    A = a_ref[...]                                   # (N, N) row-mean-normalized adjacency
    xp = xp_ref[...]                                 # (N, 2H) batch packed on lanes

    # --- SAGEConv stack (unrolled; weights stay VMEM-resident) ---------------
    for li in range(num_layers):
        agg = jnp.dot(A, xp, preferred_element_type=f32)        # neighbor mean, both batches
        xcat = jnp.concatenate([agg, xp], axis=1)               # (N, 4H): [agg | x]
        # fused lin_l + lin_r: single MXU dot, contraction = 4H (=128 for H=32)
        h = jnp.dot(xcat, wcatT_ref[li], preferred_element_type=f32) + bl_ref[li]
        if li < num_layers - 1:
            h = jnp.maximum(h, 0.0)                  # ReLU (+ eval-mode dropout = identity)
        xp = h

    # --- head: lin0 + ReLU (per batch half), then batch sum on the MXU -------
    h0 = jnp.maximum(jnp.dot(xp, w0T_ref[...], preferred_element_type=f32)
                     + b0_ref[...], 0.0)             # (N, 2H)
    # S = [[I,I],[I,I]] -> both lane halves hold (b0 + b1); no lane slicing.
    hs = jnp.dot(h0, bsum_ref[...], preferred_element_type=f32)  # (N, 2H)

    # --- gather src/dst rows: in-kernel one-hot selectors + MXU dots ---------
    n = hs.shape[0]
    col = jax.lax.broadcasted_iota(jnp.int32, (src_ref.shape[0], n), 1)   # (L_pad, N)
    sel_s = (col == src_ref[...]).astype(f32)        # padded links use index -1 -> all-zero row
    sel_d = (col == dst_ref[...]).astype(f32)
    rs = jnp.dot(sel_s, hs, preferred_element_type=f32)          # (L_pad, 2H)
    rd = jnp.dot(sel_d, hs, preferred_element_type=f32)          # (L_pad, 2H)
    p = rs * rd                                      # x_src * x_dst, duplicated in both halves

    # --- final MLP: Linear(H,H)+ReLU (W1^T zero-padded to 2H rows) -> Linear(->1)
    m = jnp.maximum(jnp.dot(p, w1T_ref[...], preferred_element_type=f32)
                    + b1_ref[...], 0.0)              # (L_pad, H)
    o_ref[...] = (jnp.dot(m, w2T_ref[...], preferred_element_type=f32)
                  + b2_ref[...]).astype(o_ref.dtype)             # (L_pad, 128), col 0 = logit


# ---------------------------------------------------------------------------
# Parameters (deterministic synthetic init; shapes follow PSAGE.__init__ with
# use_feature=False, node_embedding=None)
# ---------------------------------------------------------------------------
def init_params(key, hidden, num_layers, max_z):
    ks = iter(jax.random.split(key, 4 + 3 * num_layers + 3))
    s = 1.0 / np.sqrt(hidden)
    params = {
        "z_emb": jax.random.normal(next(ks), (max_z, hidden), jnp.float32),
        "w0": jax.random.uniform(next(ks), (hidden, hidden), jnp.float32, -s, s),
        "b0": jax.random.uniform(next(ks), (1, hidden), jnp.float32, -s, s),
        "w1": jax.random.uniform(next(ks), (hidden, hidden), jnp.float32, -s, s),
    }
    convs = []
    for _ in range(num_layers):
        convs.append((
            jax.random.uniform(next(ks), (hidden, hidden), jnp.float32, -s, s),  # lin_l weight
            jax.random.uniform(next(ks), (hidden, hidden), jnp.float32, -s, s),  # lin_r weight (no bias)
            jax.random.uniform(next(ks), (1, hidden), jnp.float32, -s, s),       # lin_l bias
        ))
    params["convs"] = convs
    params["b1"] = jax.random.uniform(next(ks), (1, hidden), jnp.float32, -s, s)
    params["w2"] = jax.random.uniform(next(ks), (1, hidden), jnp.float32, -s, s)
    params["b2"] = jax.random.uniform(next(ks), (1, 1), jnp.float32, -s, s)
    return params


def _blockdiag2(wT):
    """[[wT, 0], [0, wT]] for batch-packed lane layout."""
    z = jnp.zeros_like(wT)
    return jnp.concatenate([jnp.concatenate([wT, z], axis=1),
                            jnp.concatenate([z, wT], axis=1)], axis=0)


# ---------------------------------------------------------------------------
# One-time weight packing (hoisted out of the per-call forward path).
# ---------------------------------------------------------------------------
def prepare_params(params):
    H = params["z_emb"].shape[1]
    wcatT, bl = [], []
    for (wl, wr, b) in params["convs"]:
        # fused [lin_l ; lin_r], block-diagonal over the 2 lane-packed batches
        wcatT.append(jnp.concatenate([_blockdiag2(wl.T), _blockdiag2(wr.T)], axis=0))  # (4H, 2H)
        bl.append(jnp.concatenate([b, b], axis=-1))                                    # (1, 2H)
    return {
        "z_emb": params["z_emb"],
        "wcatT": jnp.stack(wcatT),                                        # (L, 4H, 2H)
        "bl":    jnp.stack(bl),                                           # (L, 1, 2H)
        "w0T":   _blockdiag2(params["w0"].T),                             # (2H, 2H)
        "b0":    jnp.concatenate([params["b0"], params["b0"]], axis=-1),  # (1, 2H)
        "bsum":  jnp.tile(jnp.eye(H, dtype=jnp.float32), (2, 2)),         # (2H, 2H) batch-sum matrix
        "w1T":   jnp.concatenate([params["w1"].T,
                                  jnp.zeros((H, H), jnp.float32)], axis=0),  # (2H, H)
        "b1":    params["b1"],                                            # (1, H)
        "w2T":   jnp.pad(params["w2"].T, ((0, 0), (0, 127))),             # (H, 128) lane-dense
        "b2":    jnp.pad(params["b2"], ((0, 0), (0, 127))),               # (1, 128)
    }


# ---------------------------------------------------------------------------
# Forward: XLA glue (embedding gather, dense adjacency) + one fused pallas_call.
# src_idx / dst_idx are the z==1 / z==2 node indices (static length -> jit-safe).
# ---------------------------------------------------------------------------
def psage_forward(packed, z, edge_index, src_idx, dst_idx):
    N = z.shape[0]
    num_layers = packed["wcatT"].shape[0]
    L = src_idx.shape[0]
    L_pad = max(8, ((L + 7) // 8) * 8)

    # z-embedding per the reference: table[(z==1).long()], table[(z==2).long()]
    idx = jnp.stack([(z == 1), (z == 2)], axis=0).astype(jnp.int32)      # (2, N)
    x = packed["z_emb"][idx]                                             # (2, N, H) glue gather
    xp = jnp.concatenate([x[0], x[1]], axis=-1)                          # (N, 2H) batch on lanes

    # dense mean-normalized adjacency: A[dst, src] = 1 / indeg(dst)
    src, dst = edge_index[0], edge_index[1]
    A = jnp.zeros((N, N), jnp.float32).at[dst, src].add(1.0)
    A = A / jnp.maximum(A.sum(axis=1, keepdims=True), 1.0)

    pad = L_pad - L
    src_p = jnp.pad(src_idx.astype(jnp.int32), (0, pad), constant_values=-1).reshape(L_pad, 1)
    dst_p = jnp.pad(dst_idx.astype(jnp.int32), (0, pad), constant_values=-1).reshape(L_pad, 1)

    kernel = functools.partial(_psage_kernel, num_layers=int(num_layers))
    vmem = pl.BlockSpec(memory_space=pltpu.MemorySpace.VMEM)

    out = pl.pallas_call(
        kernel,
        out_shape=jax.ShapeDtypeStruct((L_pad, 128), jnp.float32),
        in_specs=[vmem] * 13,
        out_specs=vmem,
    )(A, xp, packed["wcatT"], packed["bl"], packed["w0T"], packed["b0"],
      packed["bsum"], packed["w1T"], packed["b1"], packed["w2T"], packed["b2"],
      src_p, dst_p)

    return out[:L, :1]                                                   # (L, 1) link logits


# ---------------------------------------------------------------------------
# Pure-JAX reference (eval mode) for correctness checking.
# ---------------------------------------------------------------------------
def psage_reference(params, z, edge_index, src_idx, dst_idx):
    N = z.shape[0]
    idx = jnp.stack([(z == 1), (z == 2)], axis=0).astype(jnp.int32)
    x = params["z_emb"][idx]                                             # (2, N, H)
    src, dst = edge_index[0], edge_index[1]
    A = jnp.zeros((N, N), jnp.float32).at[dst, src].add(1.0)
    A = A / jnp.maximum(A.sum(axis=1, keepdims=True), 1.0)
    nl = len(params["convs"])
    for li, (wl, wr, b) in enumerate(params["convs"]):
        agg = jnp.einsum("ij,bjh->bih", A, x)
        x = agg @ wl.T + x @ wr.T + b
        if li < nl - 1:
            x = jnp.maximum(x, 0.0)
    x = jnp.maximum(x @ params["w0"].T + params["b0"], 0.0).sum(axis=0)  # (N, H)
    p = x[src_idx] * x[dst_idx]
    m = jnp.maximum(p @ params["w1"].T + params["b1"], 0.0)
    return m @ params["w2"].T + params["b2"]                             # (L, 1)


if __name__ == "__main__":
    N, hidden, num_layers, max_z = 16, 32, 3, 10

    params = init_params(jax.random.PRNGKey(0), hidden, num_layers, max_z)
    packed = prepare_params(params)          # one-time packing, hoisted out of forward

    # deterministic small graph: bidirected ring (E = 32 edges)
    src = np.concatenate([np.arange(N), (np.arange(N) + 1) % N]).astype(np.int32)
    dst = np.concatenate([(np.arange(N) + 1) % N, np.arange(N)]).astype(np.int32)
    edge_index = jnp.asarray(np.stack([src, dst], axis=0))               # (2, 32)

    # structural labels: two source nodes (z==1), two destination nodes (z==2)
    z_np = (np.arange(N) % 7 + 3).astype(np.int32)
    z_np[0], z_np[2] = 1, 1
    z_np[1], z_np[3] = 2, 2
    z = jnp.asarray(z_np)

    # link endpoints derived once on the host (static count) -> jit-friendly args
    src_idx = jnp.asarray(np.flatnonzero(z_np == 1).astype(np.int32))
    dst_idx = jnp.asarray(np.flatnonzero(z_np == 2).astype(np.int32))

    fwd = jax.jit(psage_forward)
    out = fwd(packed, z, edge_index, src_idx, dst_idx)                   # (2, 1) link logits
    jax.block_until_ready(out)
    assert out.shape == (2, 1)

    ref = psage_reference(params, z, edge_index, src_idx, dst_idx)
    np.testing.assert_allclose(np.asarray(out), np.asarray(ref), rtol=1e-2, atol=1e-2)
    print("KERNEL_OK")
</pallas_src>

<mosaic_0001>
module attributes {stable_mosaic.version = 11 : i64} {
  func.func @_psage_kernel(%arg0: memref<16x16xf32, #tpu.memory_space<vmem>>, %arg1: memref<16x64xf32, #tpu.memory_space<vmem>>, %arg2: memref<3x128x64xf32, #tpu.memory_space<vmem>>, %arg3: memref<3x1x64xf32, #tpu.memory_space<vmem>>, %arg4: memref<64x64xf32, #tpu.memory_space<vmem>>, %arg5: memref<1x64xf32, #tpu.memory_space<vmem>>, %arg6: memref<64x64xf32, #tpu.memory_space<vmem>>, %arg7: memref<64x32xf32, #tpu.memory_space<vmem>>, %arg8: memref<1x32xf32, #tpu.memory_space<vmem>>, %arg9: memref<32x128xf32, #tpu.memory_space<vmem>>, %arg10: memref<1x128xf32, #tpu.memory_space<vmem>>, %arg11: memref<8x1xi32, #tpu.memory_space<vmem>>, %arg12: memref<8x1xi32, #tpu.memory_space<vmem>>, %arg13: memref<8x128xf32, #tpu.memory_space<vmem>>) attributes {dimension_semantics = [], scalar_prefetch = 0 : i64, scratch_operands = 0 : i64, tpu.core_type = #tpu.core_type<tc>} {
    %c0 = arith.constant 0 : index
    %c0_0 = arith.constant 0 : index
    %0 = vector.load %arg0[%c0, %c0_0] : memref<16x16xf32, #tpu.memory_space<vmem>>, vector<16x16xf32>
    %c0_1 = arith.constant 0 : index
    %c0_2 = arith.constant 0 : index
    %1 = vector.load %arg1[%c0_1, %c0_2] : memref<16x64xf32, #tpu.memory_space<vmem>>, vector<16x64xf32>
    %cst = arith.constant dense<0.000000e+00> : vector<16x64xf32>
    %2 = tpu.matmul %0, %1, %cst {dimension_numbers = #tpu.dot_dimension_numbers<[1], [0], [0], [1], [0, 0, 1, 1], [], []>} : vector<16x16xf32>, vector<16x64xf32>, vector<16x64xf32> -> vector<16x64xf32>
    %3 = tpu.concatenate %2, %1 in 1 : vector<16x64xf32>, vector<16x64xf32> -> vector<16x128xf32>
    %c0_3 = arith.constant 0 : index
    %c0_4 = arith.constant 0 : index
    %c0_5 = arith.constant 0 : index
    %4 = vector.load %arg2[%c0_3, %c0_4, %c0_5] : memref<3x128x64xf32, #tpu.memory_space<vmem>>, vector<1x128x64xf32>
    %5 = vector.shape_cast %4 : vector<1x128x64xf32> to vector<128x64xf32>
    %cst_6 = arith.constant dense<0.000000e+00> : vector<16x64xf32>
    %6 = tpu.matmul %3, %5, %cst_6 {dimension_numbers = #tpu.dot_dimension_numbers<[1], [0], [0], [1], [0, 0, 1, 1], [], []>} : vector<16x128xf32>, vector<128x64xf32>, vector<16x64xf32> -> vector<16x64xf32>
    %c0_7 = arith.constant 0 : index
    %c0_8 = arith.constant 0 : index
    %c0_9 = arith.constant 0 : index
    %7 = vector.load %arg3[%c0_7, %c0_8, %c0_9] : memref<3x1x64xf32, #tpu.memory_space<vmem>>, vector<1x1x64xf32>
    %8 = vector.shape_cast %7 : vector<1x1x64xf32> to vector<1x64xf32>
    %9 = vector.broadcast %8 : vector<1x64xf32> to vector<16x64xf32>
    %10 = arith.addf %6, %9 : vector<16x64xf32>
    %cst_10 = arith.constant 0.000000e+00 : f32
    %11 = vector.broadcast %cst_10 : f32 to vector<16x64xf32>
    %12 = arith.maximumf %10, %11 : vector<16x64xf32>
    %cst_11 = arith.constant dense<0.000000e+00> : vector<16x64xf32>
    %13 = tpu.matmul %0, %12, %cst_11 {dimension_numbers = #tpu.dot_dimension_numbers<[1], [0], [0], [1], [0, 0, 1, 1], [], []>} : vector<16x16xf32>, vector<16x64xf32>, vector<16x64xf32> -> vector<16x64xf32>
    %14 = tpu.concatenate %13, %12 in 1 : vector<16x64xf32>, vector<16x64xf32> -> vector<16x128xf32>
    %c1 = arith.constant 1 : index
    %c0_12 = arith.constant 0 : index
    %c0_13 = arith.constant 0 : index
    %15 = vector.load %arg2[%c1, %c0_12, %c0_13] : memref<3x128x64xf32, #tpu.memory_space<vmem>>, vector<1x128x64xf32>
    %16 = vector.shape_cast %15 : vector<1x128x64xf32> to vector<128x64xf32>
    %cst_14 = arith.constant dense<0.000000e+00> : vector<16x64xf32>
    %17 = tpu.matmul %14, %16, %cst_14 {dimension_numbers = #tpu.dot_dimension_numbers<[1], [0], [0], [1], [0, 0, 1, 1], [], []>} : vector<16x128xf32>, vector<128x64xf32>, vector<16x64xf32> -> vector<16x64xf32>
    %c1_15 = arith.constant 1 : index
    %c0_16 = arith.constant 0 : index
    %c0_17 = arith.constant 0 : index
    %18 = vector.load %arg3[%c1_15, %c0_16, %c0_17] : memref<3x1x64xf32, #tpu.memory_space<vmem>>, vector<1x1x64xf32>
    %19 = vector.shape_cast %18 : vector<1x1x64xf32> to vector<1x64xf32>
    %20 = vector.broadcast %19 : vector<1x64xf32> to vector<16x64xf32>
    %21 = arith.addf %17, %20 : vector<16x64xf32>
    %cst_18 = arith.constant 0.000000e+00 : f32
    %22 = vector.broadcast %cst_18 : f32 to vector<16x64xf32>
    %23 = arith.maximumf %21, %22 : vector<16x64xf32>
    %cst_19 = arith.constant dense<0.000000e+00> : vector<16x64xf32>
    %24 = tpu.matmul %0, %23, %cst_19 {dimension_numbers = #tpu.dot_dimension_numbers<[1], [0], [0], [1], [0, 0, 1, 1], [], []>} : vector<16x16xf32>, vector<16x64xf32>, vector<16x64xf32> -> vector<16x64xf32>
    %25 = tpu.concatenate %24, %23 in 1 : vector<16x64xf32>, vector<16x64xf32> -> vector<16x128xf32>
    %c2 = arith.constant 2 : index
    %c0_20 = arith.constant 0 : index
    %c0_21 = arith.constant 0 : index
    %26 = vector.load %arg2[%c2, %c0_20, %c0_21] : memref<3x128x64xf32, #tpu.memory_space<vmem>>, vector<1x128x64xf32>
    %27 = vector.shape_cast %26 : vector<1x128x64xf32> to vector<128x64xf32>
    %cst_22 = arith.constant dense<0.000000e+00> : vector<16x64xf32>
    %28 = tpu.matmul %25, %27, %cst_22 {dimension_numbers = #tpu.dot_dimension_numbers<[1], [0], [0], [1], [0, 0, 1, 1], [], []>} : vector<16x128xf32>, vector<128x64xf32>, vector<16x64xf32> -> vector<16x64xf32>
    %c2_23 = arith.constant 2 : index
    %c0_24 = arith.constant 0 : index
    %c0_25 = arith.constant 0 : index
    %29 = vector.load %arg3[%c2_23, %c0_24, %c0_25] : memref<3x1x64xf32, #tpu.memory_space<vmem>>, vector<1x1x64xf32>
    %30 = vector.shape_cast %29 : vector<1x1x64xf32> to vector<1x64xf32>
    %31 = vector.broadcast %30 : vector<1x64xf32> to vector<16x64xf32>
    %32 = arith.addf %28, %31 : vector<16x64xf32>
    %c0_26 = arith.constant 0 : index
    %c0_27 = arith.constant 0 : index
    %33 = vector.load %arg4[%c0_26, %c0_27] : memref<64x64xf32, #tpu.memory_space<vmem>>, vector<64x64xf32>
    %cst_28 = arith.constant dense<0.000000e+00> : vector<16x64xf32>
    %34 = tpu.matmul %32, %33, %cst_28 {dimension_numbers = #tpu.dot_dimension_numbers<[1], [0], [0], [1], [0, 0, 1, 1], [], []>} : vector<16x64xf32>, vector<64x64xf32>, vector<16x64xf32> -> vector<16x64xf32>
    %c0_29 = arith.constant 0 : index
    %c0_30 = arith.constant 0 : index
    %35 = vector.load %arg5[%c0_29, %c0_30] : memref<1x64xf32, #tpu.memory_space<vmem>>, vector<1x64xf32>
    %36 = vector.broadcast %35 : vector<1x64xf32> to vector<16x64xf32>
    %37 = arith.addf %34, %36 : vector<16x64xf32>
    %cst_31 = arith.constant 0.000000e+00 : f32
    %38 = vector.broadcast %cst_31 : f32 to vector<16x64xf32>
    %39 = arith.maximumf %37, %38 : vector<16x64xf32>
    %c0_32 = arith.constant 0 : index
    %c0_33 = arith.constant 0 : index
    %40 = vector.load %arg6[%c0_32, %c0_33] : memref<64x64xf32, #tpu.memory_space<vmem>>, vector<64x64xf32>
    %cst_34 = arith.constant dense<0.000000e+00> : vector<16x64xf32>
    %41 = tpu.matmul %39, %40, %cst_34 {dimension_numbers = #tpu.dot_dimension_numbers<[1], [0], [0], [1], [0, 0, 1, 1], [], []>} : vector<16x64xf32>, vector<64x64xf32>, vector<16x64xf32> -> vector<16x64xf32>
    %42 = tpu.iota {dimensions = array<i32: 1>} : vector<8x16xi32>
    %c0_35 = arith.constant 0 : index
    %c0_36 = arith.constant 0 : index
    %43 = vector.load %arg11[%c0_35, %c0_36] : memref<8x1xi32, #tpu.memory_space<vmem>>, vector<8x1xi32>
    %44 = vector.broadcast %43 : vector<8x1xi32> to vector<8x16xi32>
    %45 = arith.cmpi eq, %42, %44 : vector<8x16xi32>
    %46 = arith.extui %45 : vector<8x16xi1> to vector<8x16xi32>
    %47 = arith.sitofp %46 : vector<8x16xi32> to vector<8x16xf32>
    %c0_37 = arith.constant 0 : index
    %c0_38 = arith.constant 0 : index
    %48 = vector.load %arg12[%c0_37, %c0_38] : memref<8x1xi32, #tpu.memory_space<vmem>>, vector<8x1xi32>
    %49 = vector.broadcast %48 : vector<8x1xi32> to vector<8x16xi32>
    %50 = arith.cmpi eq, %42, %49 : vector<8x16xi32>
    %51 = arith.extui %50 : vector<8x16xi1> to vector<8x16xi32>
    %52 = arith.sitofp %51 : vector<8x16xi32> to vector<8x16xf32>
    %cst_39 = arith.constant dense<0.000000e+00> : vector<8x64xf32>
    %53 = tpu.matmul %47, %41, %cst_39 {dimension_numbers = #tpu.dot_dimension_numbers<[1], [0], [0], [1], [0, 0, 1, 1], [], []>} : vector<8x16xf32>, vector<16x64xf32>, vector<8x64xf32> -> vector<8x64xf32>
    %cst_40 = arith.constant dense<0.000000e+00> : vector<8x64xf32>
    %54 = tpu.matmul %52, %41, %cst_40 {dimension_numbers = #tpu.dot_dimension_numbers<[1], [0], [0], [1], [0, 0, 1, 1], [], []>} : vector<8x16xf32>, vector<16x64xf32>, vector<8x64xf32> -> vector<8x64xf32>
    %55 = arith.mulf %53, %54 : vector<8x64xf32>
    %c0_41 = arith.constant 0 : index
    %c0_42 = arith.constant 0 : index
    %56 = vector.load %arg7[%c0_41, %c0_42] : memref<64x32xf32, #tpu.memory_space<vmem>>, vector<64x32xf32>
    %cst_43 = arith.constant dense<0.000000e+00> : vector<8x32xf32>
    %57 = tpu.matmul %55, %56, %cst_43 {dimension_numbers = #tpu.dot_dimension_numbers<[1], [0], [0], [1], [0, 0, 1, 1], [], []>} : vector<8x64xf32>, vector<64x32xf32>, vector<8x32xf32> -> vector<8x32xf32>
    %c0_44 = arith.constant 0 : index
    %c0_45 = arith.constant 0 : index
    %58 = vector.load %arg8[%c0_44, %c0_45] : memref<1x32xf32, #tpu.memory_space<vmem>>, vector<1x32xf32>
    %59 = vector.broadcast %58 : vector<1x32xf32> to vector<8x32xf32>
    %60 = arith.addf %57, %59 : vector<8x32xf32>
    %cst_46 = arith.constant 0.000000e+00 : f32
    %61 = vector.broadcast %cst_46 : f32 to vector<8x32xf32>
    %62 = arith.maximumf %60, %61 : vector<8x32xf32>
    %c0_47 = arith.constant 0 : index
    %c0_48 = arith.constant 0 : index
    %63 = vector.load %arg9[%c0_47, %c0_48] : memref<32x128xf32, #tpu.memory_space<vmem>>, vector<32x128xf32>
    %cst_49 = arith.constant dense<0.000000e+00> : vector<8x128xf32>
    %64 = tpu.matmul %62, %63, %cst_49 {dimension_numbers = #tpu.dot_dimension_numbers<[1], [0], [0], [1], [0, 0, 1, 1], [], []>} : vector<8x32xf32>, vector<32x128xf32>, vector<8x128xf32> -> vector<8x128xf32>
    %c0_50 = arith.constant 0 : index
    %c0_51 = arith.constant 0 : index
    %65 = vector.load %arg10[%c0_50, %c0_51] : memref<1x128xf32, #tpu.memory_space<vmem>>, vector<1x128xf32>
    %66 = vector.broadcast %65 : vector<1x128xf32> to vector<8x128xf32>
    %67 = arith.addf %64, %66 : vector<8x128xf32>
    %c0_52 = arith.constant 0 : index
    %c0_53 = arith.constant 0 : index
    %68 = vector.load %arg13[%c0_52, %c0_53] : memref<8x128xf32, #tpu.memory_space<vmem>>, vector<8x128xf32>
    tpu.vector_store %arg13[%c0_52, %c0_53], %67 {strides = array<i32>} : memref<8x128xf32, #tpu.memory_space<vmem>>, vector<8x128xf32>,
    return
  }
}

</mosaic_0001>

<bundles_post_ra>
// kernel: psage_forward.1
= control target key start
LH: loop header
LB: loop body
LE: loop exit
PB: predicated region body
PF: predicated region fallthrough
CT: control target
= control target key end

     0   :  { %vm48_vm0 = vcmask 130048   ;;  %s569_s14 = smov 64   ;;  %vm86_vm1 = vcmask 523264   ;;  %vm479_vm4 = vcmask 261120   ;;  %s944_s1 = inlined_call_operand.vmem [shape: f32[16,64], index: 1, kind: input, shape index: {}]   ;;  %s945_s0 = inlined_call_operand.vmem [shape: f32[16,16], index: 0, kind: input, shape index: {}]   ;;  %s946_s2 = inlined_call_operand.vmem [shape: f32[3,128,64], index: 2, kind: input, shape index: {}]   ;;  %s947_s3 = inlined_call_operand.vmem [shape: f32[3,1,64], index: 3, kind: input, shape index: {}]   ;;  %s948_s4 = inlined_call_operand.vmem [shape: f32[64,64], index: 4, kind: input, shape index: {}]   ;;  %s949_s5 = inlined_call_operand.vmem [shape: f32[1,64], index: 5, kind: input, shape index: {}]   ;;  %s950_s6 = inlined_call_operand.vmem [shape: f32[64,64], index: 6, kind: input, shape index: {}]   ;;  %s951_s11 = inlined_call_operand.vmem [shape: s32[8,1], index: 11, kind: input, shape index: {}]   ;;  %s952_s12 = inlined_call_operand.vmem [shape: s32[8,1], index: 12, kind: input, shape index: {}]   ;;  %s953_s7 = inlined_call_operand.vmem [shape: f32[64,32], index: 7, kind: input, shape index: {}]   ;;  %s954_s8 = inlined_call_operand.vmem [shape: f32[1,32], index: 8, kind: input, shape index: {}]   ;;  %s955_s9 = inlined_call_operand.vmem [shape: f32[32,128], index: 9, kind: input, shape index: {}]   ;;  %s956_s10 = inlined_call_operand.vmem [shape: f32[1,128], index: 10, kind: input, shape index: {}]   ;;  %s957_s13 = inlined_call_operand.vmem [shape: f32[8,128], index: 13, kind: output, shape index: {}]  }
   0x1   :  { %v47_v0 = vld [vmem:[%s944_s1 + $0x8] sm:$0xff]  ;;  %v46_v1 = vld [vmem:[%s944_s1] sm:$0xff]  ;;  %v104_v3 = vld [vmem:[%s946_s2 + $0x78] sm:$0xff] }
   0x2   :  { %69 = vmatpush.msra.mxu0 %v47_v0  ;;  %v651_v2 = vld [vmem:[%s945_s0] sm:$0xff]  ;;  %80 = vrot.lane.b32.xlu0 %v46_v1, %s569_s14  ;;  %v103_v4 = vld [vmem:[%s946_s2 + $0x70] sm:$0xff]  ;;  %v102_v5 = vld [vmem:[%s946_s2 + $0x68] sm:$0xff] }
   0x3   :  { %109 = vmatpush.msra.mxu1 %v104_v3  ;;  %v101_v6 = vld [vmem:[%s946_s2 + $0x60] sm:$0xff]  ;;  %v100_v7 = vld [vmem:[%s946_s2 + $0x58] sm:$0xff]  ;;  %v674_v8 = vld [vmem:[%s945_s0 + $0x8] sm:$0xff] }
   0x4   :  { %70 = vmatpush.msra.mxu0 %v46_v1  ;;  %v99_v9 = vld [vmem:[%s946_s2 + $0x50] sm:$0xff]  ;;  %v98_v10 = vld [vmem:[%s946_s2 + $0x48] sm:$0xff]  ;;  %v97_v11 = vld [vmem:[%s946_s2 + $0x40] sm:$0xff] }
   0x5   :  { %508 = vmatmul.msk.f32.vlgmr.msra.gmra.mxu0 %vm48_vm0, %v651_v2  ;;  %110 = vmatpush.msra.mxu1 %v103_v4  ;;  %v96_v12 = vld [vmem:[%s946_s2 + $0x38] sm:$0xff]  ;;  %v95_v13 = vld [vmem:[%s946_s2 + $0x30] sm:$0xff]  ;;  %v94_v14 = vld [vmem:[%s946_s2 + $0x28] sm:$0xff] }
   0x6   :  { %v93_v15 = vld [vmem:[%s946_s2 + $0x20] sm:$0xff]  ;;  %v92_v16 = vld [vmem:[%s946_s2 + $0x18] sm:$0xff]  ;;  %v91_v17 = vld [vmem:[%s946_s2 + $0x10] sm:$0xff] }
   0x7   :  { %111 = vmatpush.msra.mxu1 %v102_v5  ;;  %v90_v18 = vld [vmem:[%s946_s2 + $0x8] sm:$0xff]  ;;  %v89_v19 = vld [vmem:[%s946_s2] sm:$0xff]  ;;  %v527_v26 = vld [vmem:[%s946_s2 + $0xf8] sm:$0xff] }
   0x8   :  { %189 = vmatpush.msra.mxu3 %v527_v26  ;;  %v563_v27 = vld [vmem:[%s947_s3] ss:$0 sm:$0xff]  ;;  %v526_v34 = vld [vmem:[%s946_s2 + $0xf0] sm:$0xff]  ;;  %v525_v35 = vld [vmem:[%s946_s2 + $0xe8] sm:$0xff] }
   0x9   :  { %112 = vmatpush.msra.mxu1 %v101_v6  ;;  %v524_v36 = vld [vmem:[%s946_s2 + $0xe0] sm:$0xff]  ;;  %v523_v37 = vld [vmem:[%s946_s2 + $0xd8] sm:$0xff]  ;;  %v522_v38 = vld [vmem:[%s946_s2 + $0xd0] sm:$0xff] }
   0xa   :  { %82 = vrot.lane.b32.xlu0 %v47_v0, %s569_s14  ;;  %190 = vmatpush.msra.mxu3 %v526_v34  ;;  %v521_v39 = vld [vmem:[%s946_s2 + $0xc8] sm:$0xff]  ;;  %v520_v40 = vld [vmem:[%s946_s2 + $0xc0] sm:$0xff]  ;;  %v519_v41 = vld [vmem:[%s946_s2 + $0xb8] sm:$0xff] }
   0xb   :  { %113 = vmatpush.msra.mxu1 %v100_v7  ;;  %v518_v42 = vld [vmem:[%s946_s2 + $0xb0] sm:$0xff]  ;;  %v517_v43 = vld [vmem:[%s946_s2 + $0xa8] sm:$0xff]  ;;  %v516_v44 = vld [vmem:[%s946_s2 + $0xa0] sm:$0xff] }
   0xc   :  { %191 = vmatpush.msra.mxu3 %v525_v35  ;;  %v515_v45 = vld [vmem:[%s946_s2 + $0x98] sm:$0xff]  ;;  %v514_v46 = vld [vmem:[%s946_s2 + $0x90] sm:$0xff]  ;;  %v513_v47 = vld [vmem:[%s946_s2 + $0x88] sm:$0xff] }
   0xd   :  { %509 = vmatmul.msk.f32.gmra.mxu0 %vm48_vm0, %v674_v8  ;;  %114 = vmatpush.msra.mxu1 %v99_v9  ;;  %v512_v48 = vld [vmem:[%s946_s2 + $0x80] sm:$0xff]  ;;  %v546_v62 = vld [vmem:[%s946_s2 + $0x178] sm:$0xff]  ;;  %v545_v63 = vld [vmem:[%s946_s2 + $0x170] sm:$0xff] }
   0xe   :  { %192 = vmatpush.msra.mxu3 %v524_v36  ;;  %v564_v55 = vld [vmem:[%s947_s3 + $0x1] ss:$0 sm:$0xff]  ;;  %v544_v0 = vld [vmem:[%s946_s2 + $0x168] sm:$0xff]  ;;  %v541_v3 = vld [vmem:[%s946_s2 + $0x150] sm:$0xff] }
   0xf   :  { %115 = vmatpush.msra.mxu1 %v98_v10  ;;  %v543_v1 = vld [vmem:[%s946_s2 + $0x160] sm:$0xff]  ;;  %v540_v4 = vld [vmem:[%s946_s2 + $0x148] sm:$0xff]  ;;  %v538_v6 = vld [vmem:[%s946_s2 + $0x138] sm:$0xff] }
  0x10   :  { %193 = vmatpush.msra.mxu3 %v523_v37  ;;  %v539_v5 = vld [vmem:[%s946_s2 + $0x140] sm:$0xff]  ;;  %v537_v7 = vld [vmem:[%s946_s2 + $0x130] sm:$0xff]  ;;  %v534_v10 = vld [vmem:[%s946_s2 + $0x118] sm:$0xff] }
  0x11   :  { %116 = vmatpush.msra.mxu1 %v97_v11  ;;  %v535_v9 = vld [vmem:[%s946_s2 + $0x120] sm:$0xff]  ;;  %v533_v11 = vld [vmem:[%s946_s2 + $0x110] sm:$0xff]  ;;  %v293_v26 = vld [vmem:[%s948_s4 + $0x8] sm:$0xff] }
  0x12   :  { %194 = vmatpush.msra.mxu3 %v522_v38  ;;  %v337_v38 = vld [vmem:[%s950_s6 + $0x10] sm:$0xff] }
  0x13   :  { %117 = vmatpush.msra.mxu1 %v96_v12  ;;  %v532_v12 = vld [vmem:[%s946_s2 + $0x108] sm:$0xff] }
  0x14   :  { %195 = vmatpush.msra.mxu3 %v521_v39  ;;  %v336_v39 = vld [vmem:[%s950_s6 + $0x8] sm:$0xff] }
  0x15   :  { %118 = vmatpush.msra.mxu1 %v95_v13  ;;  %v531_v13 = vld [vmem:[%s946_s2 + $0x100] sm:$0xff] }
  0x16   :  { %196 = vmatpush.msra.mxu3 %v520_v40  ;;  %v335_v40 = vld [vmem:[%s950_s6] sm:$0xff] }
  0x17   :  { %119 = vmatpush.msra.mxu1 %v94_v14  ;;  %v299_v14 = vld [vmem:[%s948_s4 + $0x38] sm:$0xff] }
  0x18   :  { %197 = vmatpush.msra.mxu3 %v519_v41  ;;  %v374_v41 = vld [vmem:[%s951_s11] sm:$0xff] }
  0x19   :  { %120 = vmatpush.msra.mxu1 %v93_v15  ;;  %v298_v15 = vld [vmem:[%s948_s4 + $0x30] sm:$0xff] }
  0x1a   :  { %198 = vmatpush.msra.mxu3 %v518_v42  ;;  %v381_v42 = vld [vmem:[%s952_s12] sm:$0xff] }
  0x1b   :  { %121 = vmatpush.msra.mxu1 %v92_v16  ;;  %v297_v16 = vld [vmem:[%s948_s4 + $0x28] sm:$0xff] }
  0x1c   :  { %199 = vmatpush.msra.mxu3 %v517_v43  ;;  %v570_v43 = vmov 0  }
  0x1d   :  { %122 = vmatpush.msra.mxu1 %v91_v17  ;;  %v296_v17 = vld [vmem:[%s948_s4 + $0x20] sm:$0xff]  ;;  %561 = vset.pattern.permute.xlu0 %v570_v43 }
  0x1e   :  { %200 = vmatpush.msra.mxu3 %v516_v44  ;;  %562 = vset.pattern.permute.xlu1 %v570_v43  ;;  %v566_v44 = vld [vmem:[%s949_s5] ss:$0 sm:$0xff] }
  0x1f   :  { %123 = vmatpush.msra.mxu1 %v90_v18  ;;  %v295_v18 = vld [vmem:[%s948_s4 + $0x18] sm:$0xff]  ;;  %376 = vperm.xlu0 %561, %v374_v41  }
  0x20   :  { %201 = vmatpush.msra.mxu3 %v515_v45 }
  0x21   :  { %124 = vmatpush.msra.mxu1 %v89_v19  ;;  %v294_v19 = vld [vmem:[%s948_s4 + $0x10] sm:$0xff] }
  0x22   :  { %202 = vmatpush.msra.mxu3 %v514_v46 }
  0x24   :  { %203 = vmatpush.msra.mxu3 %v513_v47 }
  0x26   :  { %204 = vmatpush.msra.mxu3 %v512_v48 }
  0x74   :  { %v81_v20 = vpop.permute.xlu0 %80 }
  0x7c   :  { %v83_v23 = vpop.permute.xlu0 %82 }
  0x82   :  { %v72_v21 = vpop.f32.mrf.mxu0 }
  0x83   :  { %v87_v22 = vsel %vm86_vm1, %v72_v21, %v81_v20 }
  0x84   :  { %125 = vmatmul.f32.vlgmr.msra.gmra.mxu1 %v87_v22 }
  0x8a   :  { %v75_v24 = vpop.f32.mrf.mxu0 }
  0x8b   :  { %v88_v25 = vsel %vm86_vm1, %v75_v24, %v83_v23 }
  0x8c   :  { %128 = vmatmul.f32.gmra.mxu1 %v88_v25 }
 0x101   :  { %v126_v28 = vpop.f32.mrf.mxu1 }
 0x102   :  { %v127_v29 = vadd.f32 %v563_v27, %v126_v28  ;;  %v342_v28 = vld [vmem:[%s950_s6 + $0x38] sm:$0xff] }
 0x103   :  { %357 = vmatpush.msrb.mxu1 %v342_v28 }
 0x104   :  { %v132_v30 = vmax.f32 %v127_v29, 0.0  ;;  %v341_v29 = vld [vmem:[%s950_s6 + $0x30] sm:$0xff] }
 0x105   :  { %358 = vmatpush.msrb.mxu1 %v341_v29 }
 0x106   :  { %159 = vrot.lane.b32.xlu1 %v132_v30, %s569_s14 }
 0x109   :  { %v129_v31 = vpop.f32.mrf.mxu1 }
 0x10a   :  { %v130_v32 = vadd.f32 %v563_v27, %v129_v31  ;;  %v292_v27 = vld [vmem:[%s948_s4] sm:$0xff] }
 0x10b   :  { %v339_v31 = vld [vmem:[%s950_s6 + $0x20] sm:$0xff] }
 0x10c   :  { %v133_v33 = vmax.f32 %v130_v32, 0.0  ;;  %v338_v32 = vld [vmem:[%s950_s6 + $0x18] sm:$0xff] }
 0x10e   :  { %161 = vrot.lane.b32.xlu1 %v133_v33, %s569_s14  ;;  %148 = vmatpush.msra.mxu2 %v133_v33  ;;  %v565_v33 = vld [vmem:[%s947_s3 + $0x2] ss:$0 sm:$0xff] }
 0x110   :  { %149 = vmatpush.msra.mxu2 %v132_v30  ;;  %v340_v30 = vld [vmem:[%s950_s6 + $0x28] sm:$0xff] }
 0x111   :  { %510 = vmatmul.msk.f32.vlgmr.msra.gmra.mxu2 %vm48_vm0, %v651_v2  ;;  %359 = vmatpush.msrb.mxu1 %v340_v30 }
 0x112   :  { %269 = vmatpush.msrb.mxu2 %v546_v62 }
 0x113   :  { %360 = vmatpush.msrb.mxu1 %v339_v31 }
 0x114   :  { %270 = vmatpush.msrb.mxu2 %v545_v63 }
 0x115   :  { %361 = vmatpush.msrb.mxu1 %v338_v32 }
 0x116   :  { %271 = vmatpush.msrb.mxu2 %v544_v0  ;;  %383 = vperm.xlu1 %562, %v381_v42   ;;  %v571_v0 = vmov 0.0  }
 0x117   :  { %362 = vmatpush.msrb.mxu1 %v337_v38 }
 0x118   :  { %272 = vmatpush.msrb.mxu2 %v543_v1 }
 0x119   :  { %511 = vmatmul.msk.f32.gmra.mxu2 %vm48_vm0, %v674_v8  ;;  %363 = vmatpush.msrb.mxu1 %v336_v39 }
 0x11b   :  { %364 = vmatpush.msrb.mxu1 %v335_v40 }
 0x178   :  { %v160_v49 = vpop.permute.xlu1 %159 }
 0x180   :  { %v162_v52 = vpop.permute.xlu1 %161 }
 0x188   :  { %v384_v62 = vpop.permute.xlu1 %383 }
 0x194   :  { %v151_v50 = vpop.f32.mrf.mxu2 }
 0x195   :  { %v165_v51 = vsel %vm86_vm1, %v151_v50, %v160_v49 }
 0x196   :  { %205 = vmatmul.f32.vlgmr.msra.gmra.mxu3 %v165_v51  ;;  %v442_v51 = vld [vmem:[%s953_s7 + $0x38] sm:$0xff] }
 0x19c   :  { %v154_v53 = vpop.f32.mrf.mxu2 }
 0x19d   :  { %v166_v54 = vsel %vm86_vm1, %v154_v53, %v162_v52  ;;  %v441_v52 = vld [vmem:[%s953_s7 + $0x30] sm:$0xff]  ;;  %v440_v53 = vld [vmem:[%s953_s7 + $0x28] sm:$0xff] }
 0x19e   :  { %208 = vmatmul.f32.gmra.mxu3 %v166_v54  ;;  %v439_v54 = vld [vmem:[%s953_s7 + $0x20] sm:$0xff] }
 0x219   :  { %v206_v56 = vpop.f32.mrf.mxu3 }
 0x21a   :  { %v207_v57 = vadd.f32 %v564_v55, %v206_v56  ;;  %v437_v56 = vld [vmem:[%s953_s7 + $0x10] sm:$0xff] }
 0x21c   :  { %v212_v58 = vmax.f32 %v207_v57, 0.0  ;;  %v436_v57 = vld [vmem:[%s953_s7 + $0x8] sm:$0xff] }
 0x21e   :  { %239 = vrot.lane.b32.xlu2 %v212_v58, %s569_s14 }
 0x221   :  { %v209_v59 = vpop.f32.mrf.mxu3 }
 0x222   :  { %v210_v60 = vadd.f32 %v564_v55, %v209_v59  ;;  %v438_v55 = vld [vmem:[%s953_s7 + $0x18] sm:$0xff] }
 0x224   :  { %v213_v61 = vmax.f32 %v210_v60, 0.0 }
 0x226   :  { %241 = vrot.lane.b32.xlu2 %v213_v61, %s569_s14  ;;  %228 = vmatpush.msrb.mxu0 %v213_v61  ;;  %v377_v61 = vpop.permute.xlu0 %376 }
 0x228   :  { %229 = vmatpush.msrb.mxu0 %v212_v58  ;;  %v372_v58 = vlaneseq }
 0x229   :  { %529 = vmatmul.msk.f32.vlgmr.msrb.gmra.mxu0 %vm48_vm0, %v651_v2  ;;  %v542_v2 = vld [vmem:[%s946_s2 + $0x158] sm:$0xff] }
 0x22a   :  { %273 = vmatpush.msrb.mxu2 %v542_v2  ;;  %318 = vmatpush.msra.mxu0 %v299_v14  ;;  %v373_v60 = vand.u32 127, %v372_v58 }
 0x22c   :  { %274 = vmatpush.msrb.mxu2 %v541_v3  ;;  %319 = vmatpush.msra.mxu0 %v298_v15  ;;  %vm378_vm2 = vcmp.eq.s32.totalorder %v373_v60, %v377_v61  ;;  %vm385_vm3 = vcmp.eq.s32.totalorder %v373_v60, %v384_v62  ;;  %v435_v3 = vld [vmem:[%s953_s7] sm:$0xff] }
 0x22d   :  { %v552_v1 = vsel %vm378_vm2, 1.0, %v571_v0  ;;  %v553_v2 = vsel %vm385_vm3, 1.0, %v571_v0  ;;  %v568_v15 = vld [vmem:[%s956_s10] ss:$0 sm:$0xff] }
 0x22e   :  { %275 = vmatpush.msrb.mxu2 %v540_v4  ;;  %320 = vmatpush.msra.mxu0 %v297_v16  ;;  %v474_v4 = vld [vmem:[%s955_s9 + $0x18] sm:$0xff] }
 0x230   :  { %276 = vmatpush.msrb.mxu2 %v539_v5  ;;  %321 = vmatpush.msra.mxu0 %v296_v17  ;;  %v473_v5 = vld [vmem:[%s955_s9 + $0x10] sm:$0xff] }
 0x231   :  { %530 = vmatmul.msk.f32.gmra.mxu0 %vm48_vm0, %v674_v8  ;;  %v536_v8 = vld [vmem:[%s946_s2 + $0x128] sm:$0xff] }
 0x232   :  { %277 = vmatpush.msrb.mxu2 %v538_v6  ;;  %322 = vmatpush.msra.mxu0 %v295_v18 }
 0x234   :  { %278 = vmatpush.msrb.mxu2 %v537_v7  ;;  %323 = vmatpush.msra.mxu0 %v294_v19 }
 0x236   :  { %279 = vmatpush.msrb.mxu2 %v536_v8  ;;  %324 = vmatpush.msra.mxu0 %v293_v26 }
 0x238   :  { %280 = vmatpush.msrb.mxu2 %v535_v9  ;;  %325 = vmatpush.msra.mxu0 %v292_v27  ;;  %v472_v9 = vld [vmem:[%s955_s9 + $0x8] sm:$0xff] }
 0x23a   :  { %281 = vmatpush.msrb.mxu2 %v534_v10  ;;  %v471_v10 = vld [vmem:[%s955_s9] sm:$0xff] }
 0x23c   :  { %282 = vmatpush.msrb.mxu2 %v533_v11  ;;  %v567_v11 = vld [vmem:[%s954_s8] ss:$0 sm:$0xff] }
 0x23e   :  { %283 = vmatpush.msrb.mxu2 %v532_v12 }
 0x240   :  { %284 = vmatpush.msrb.mxu2 %v531_v13 }
 0x242   :  { %458 = vmatpush.msra.mxu2 %v442_v51 }
 0x244   :  { %459 = vmatpush.msra.mxu2 %v441_v52 }
 0x246   :  { %460 = vmatpush.msra.mxu2 %v440_v53 }
 0x248   :  { %461 = vmatpush.msra.mxu2 %v439_v54 }
 0x24a   :  { %462 = vmatpush.msra.mxu2 %v438_v55 }
 0x24c   :  { %463 = vmatpush.msra.mxu2 %v437_v56 }
 0x24e   :  { %464 = vmatpush.msra.mxu2 %v436_v57 }
 0x250   :  { %465 = vmatpush.msra.mxu2 %v435_v3 }
 0x278   :  { %v240_v20 = vpop.permute.xlu2 %239 }
 0x280   :  { %v242_v23 = vpop.permute.xlu2 %241 }
 0x2a6   :  { %v231_v21 = vpop.f32.mrf.mxu0 }
 0x2a7   :  { %v245_v22 = vsel %vm86_vm1, %v231_v21, %v240_v20 }
 0x2a8   :  { %285 = vmatmul.f32.vlgmr.msrb.gmra.mxu2 %v245_v22 }
 0x2ae   :  { %v234_v24 = vpop.f32.mrf.mxu0 }
 0x2af   :  { %v246_v25 = vsel %vm86_vm1, %v234_v24, %v242_v23 }
 0x2b0   :  { %288 = vmatmul.f32.gmra.mxu2 %v246_v25 }
 0x32b   :  { %v286_v34 = vpop.f32.mrf.mxu2 }
 0x32c   :  { %v287_v35 = vadd.f32 %v565_v33, %v286_v34 }
 0x32e   :  { %548 = vmatmul.msk.f32.vlgmr.msra.gmra.mxu0 %vm86_vm1, %v287_v35 }
 0x333   :  { %v289_v36 = vpop.f32.mrf.mxu2 }
 0x334   :  { %v290_v37 = vadd.f32 %v565_v33, %v289_v36 }
 0x336   :  { %549 = vmatmul.msk.f32.gmra.mxu0 %vm86_vm1, %v290_v37 }
 0x3ab   :  { %v327_v45 = vpop.f32.mrf.mxu0 }
 0x3ac   :  { %v328_v46 = vadd.f32 %v566_v44, %v327_v45 }
 0x3ae   :  { %v333_v47 = vmax.f32 %v328_v46, 0.0 }
 0x3b0   :  { %550 = vmatmul.msk.f32.vlgmr.msrb.gmra.mxu1 %vm86_vm1, %v333_v47 }
 0x3b3   :  { %v330_v48 = vpop.f32.mrf.mxu0 }
 0x3b4   :  { %v331_v49 = vadd.f32 %v566_v44, %v330_v48 }
 0x3b6   :  { %v334_v50 = vmax.f32 %v331_v49, 0.0 }
 0x3b8   :  { %551 = vmatmul.msk.f32.gmra.mxu1 %vm86_vm1, %v334_v50 }
 0x42d   :  { %v366_v59 = vpop.f32.mrf.mxu1 }
 0x435   :  { %v369_v63 = vpop.f32.mrf.mxu1 }
 0x436   :  { %405 = vmatpush.msrb.mxu3 %v369_v63  ;;  %428 = vmatpush.msrb.mxu0 %v369_v63 }
 0x438   :  { %406 = vmatpush.msrb.mxu3 %v366_v59  ;;  %429 = vmatpush.msrb.mxu0 %v366_v59 }
 0x439   :  { %554 = vmatmul.msk.f32.vlgmr.msrb.gmra.mxu3 %vm48_vm0, %v552_v1  ;;  %555 = vmatmul.msk.f32.vlgmr.msrb.gmra.mxu0 %vm48_vm0, %v553_v2 }
 0x43a   :  { %495 = vmatpush.msra.mxu3 %v474_v4 }
 0x43c   :  { %496 = vmatpush.msra.mxu3 %v473_v5 }
 0x43e   :  { %497 = vmatpush.msra.mxu3 %v472_v9 }
 0x440   :  { %498 = vmatpush.msra.mxu3 %v471_v10 }
 0x4b6   :  { %v431_v6 = vpop.f32.mrf.mxu0 }
 0x4bc   :  { %v408_v7 = vpop.f32.mrf.mxu3 }
 0x4bd   :  { %v434_v8 = vmul.f32 %v431_v6, %v408_v7 }
 0x4bf   :  { %556 = vmatmul.msk.f32.vlgmr.msra.gmra.mxu2 %vm86_vm1, %v434_v8 }
 0x542   :  { %v467_v12 = vpop.f32.mrf.mxu2 }
 0x543   :  { %v468_v13 = vadd.f32 %v567_v11, %v467_v12 }
 0x545   :  { %v470_v14 = vmax.f32 %v468_v13, 0.0 }
 0x547   :  { %557 = vmatmul.msk.f32.vlgmr.msra.gmra.mxu3 %vm479_vm4, %v470_v14 }
 0x5ca   :  { %v500_v16 = vpop.f32.mrf.mxu3 }
 0x5cb   :  { %v501_v17 = vadd.f32 %v568_v15, %v500_v16 }
 0x5cd   :  { %503 = vst [vmem:[%s957_s13] sm:$0xff] %v501_v17 }

</bundles_post_ra>
